<compile_context>
chip_gen: v6e
topology: v6e:2x2x1
jax: 0.10.0
libtpu: 0.0.40
codegen_flags: <defaults>
</compile_context>

<pallas_src>
import jax
import jax.numpy as jnp
from jax.experimental import pallas as pl
from jax.experimental.pallas import tpu as pltpu


def _round_up(n, m):
    return ((n + m - 1) // m) * m


def bll_kernel(x_ref, wb_ref, bb_ref, wl_ref, bl_ref, out_ref, h_acc):
    """Fused backbone-MLP + Bayesian last layer for one (batch, D) tile.

    x_ref  : [TB, TD]  bf16   flattened image batch tile (D-chunk)
    wb_ref : [TD, Fp]  bf16   backbone weight chunk (pre-transposed, lane-padded)
    bb_ref : [1,  Fp]  f32    backbone bias (lane-padded)
    wl_ref : [Fp, Kp]  f32    last-layer weight (pre-transposed, lane-padded)
    bl_ref : [1,  Kp]  f32    last-layer bias (lane-padded)
    out_ref: [TB, Kp]  f32    logits (lane-dense; wrapper slices back to K)
    h_acc  : [TB, Fp]  f32    VMEM accumulator for the backbone pre-activation
    """
    k = pl.program_id(1)

    @pl.when(k == 0)
    def _init():
        h_acc[...] = jnp.zeros_like(h_acc)

    # backbone partial product: x_chunk @ Wb_chunk  (bf16 MXU, f32 accumulate)
    h_acc[...] += jnp.dot(x_ref[...], wb_ref[...],
                          preferred_element_type=jnp.float32)

    @pl.when(k == pl.num_programs(1) - 1)
    def _finalize():
        # backbone bias + ReLU in f32 (VPU)
        h = jnp.maximum(h_acc[...] + bb_ref[...], 0.0)
        # Bayesian last layer: logits = features @ Wl + bl (tiny; kept in f32)
        logits = jnp.dot(h, wl_ref[...],
                         preferred_element_type=jnp.float32) + bl_ref[...]
        out_ref[...] = logits.astype(out_ref.dtype)


def bayesian_last_layer_forward(x_nchw, wb, bb, wl, bl,
                                *, batch_tile=256, d_tile=512):
    """Wrapper: flatten NCHW, pad to lane-dense shapes, tile batch + D, call Pallas."""
    B = x_nchw.shape[0]
    x_flat = x_nchw.reshape(B, -1)          # [B, C*H*W] row-major (== torch .view)
    D = x_flat.shape[1]
    F = wb.shape[1]
    K = wl.shape[1]

    LANE, SUB = 128, 8
    Fp = _round_up(F, LANE)
    Kp = _round_up(K, LANE)

    # Reduction (D) tiling: TD is a multiple of 128 and Dp a multiple of TD,
    # so the grid divides evenly and padded zero-columns are inert.
    TD = min(d_tile, _round_up(D, LANE))
    Dp = _round_up(D, TD)
    n_d = Dp // TD

    # Batch tiling: TB is a multiple of 8 and Bp a multiple of TB.
    TB = min(batch_tile, _round_up(B, SUB))
    Bp = _round_up(B, TB)
    n_b = Bp // TB

    # Zero-pad once in the wrapper; zero rows/cols contribute nothing and the
    # padded logits rows/cols are sliced off below.  x / wb ship as bf16
    # (they dominate HBM bytes); biases and the small last-layer weight stay f32.
    x_p = jnp.zeros((Bp, Dp), jnp.bfloat16).at[:B, :D].set(x_flat.astype(jnp.bfloat16))
    wb_p = jnp.zeros((Dp, Fp), jnp.bfloat16).at[:D, :F].set(wb.astype(jnp.bfloat16))
    bb_p = jnp.zeros((1, Fp), jnp.float32).at[:, :F].set(bb.astype(jnp.float32))
    wl_p = jnp.zeros((Fp, Kp), jnp.float32).at[:F, :K].set(wl.astype(jnp.float32))
    bl_p = jnp.zeros((1, Kp), jnp.float32).at[:, :K].set(bl.astype(jnp.float32))

    # Advisory cost estimate for XLA's scheduler.
    flops = 2 * Bp * Dp * Fp + 2 * Bp * Fp * Kp
    bytes_accessed = (x_p.size * 2 + wb_p.size * 2 + bb_p.size * 4
                      + wl_p.size * 4 + bl_p.size * 4 + Bp * Kp * 4)
    cost = pl.CostEstimate(flops=flops, transcendentals=0,
                           bytes_accessed=bytes_accessed)

    # VMEM budget: double-buffered x/wb/out tiles + resident small operands +
    # f32 accumulator, with 2x headroom; clamp to a safe ceiling
    # (64 MiB == v7x physical VMEM per TC).
    vmem_need = (2 * TB * TD * 2 + 2 * TD * Fp * 2 + 2 * TB * Kp * 4
                 + 2 * (Fp * 4 + Fp * Kp * 4 + Kp * 4)
                 + TB * Fp * 4)
    vmem_limit = int(min(max(2 * vmem_need, 32 * 1024 * 1024), 64 * 1024 * 1024))

    out_p = pl.pallas_call(
        bll_kernel,
        out_shape=jax.ShapeDtypeStruct((Bp, Kp), jnp.float32),
        grid_spec=pltpu.PrefetchScalarGridSpec(
            num_scalar_prefetch=0,
            grid=(n_b, n_d),
            in_specs=[
                pl.BlockSpec((TB, TD), lambda i, k: (i, k)),   # x: batch+D tiled
                pl.BlockSpec((TD, Fp), lambda i, k: (k, 0)),   # wb: D tiled
                pl.BlockSpec((1, Fp), lambda i, k: (0, 0)),    # bb: resident
                pl.BlockSpec((Fp, Kp), lambda i, k: (0, 0)),   # wl: resident
                pl.BlockSpec((1, Kp), lambda i, k: (0, 0)),    # bl: resident
            ],
            out_specs=pl.BlockSpec((TB, Kp), lambda i, k: (i, 0)),
            scratch_shapes=[pltpu.VMEM((TB, Fp), jnp.float32)],
        ),
        compiler_params=pltpu.CompilerParams(
            dimension_semantics=("parallel", "arbitrary"),
            vmem_limit_bytes=vmem_limit,
        ),
        cost_estimate=cost,
    )(x_p, wb_p, bb_p, wl_p, bl_p)

    return out_p[:B, :K]


def reference_forward(x_nchw, wb, bb, wl, bl):
    """Pure-JAX reference matching the kernel's bf16 operand rounding."""
    B = x_nchw.shape[0]
    x_flat = x_nchw.reshape(B, -1).astype(jnp.bfloat16).astype(jnp.float32)
    wb_f = wb.astype(jnp.bfloat16).astype(jnp.float32)
    h = jnp.maximum(x_flat @ wb_f + bb.astype(jnp.float32), 0.0)
    return h @ wl.astype(jnp.float32) + bl.astype(jnp.float32)


if __name__ == "__main__":
    # Small, deterministic shapes consistent with the module's forward.
    B, C, H, W = 8, 4, 16, 16       # NCHW image batch
    D = C * H * W                   # flattened backbone input (1024)
    input_dim = 32                  # penultimate feature dim (backbone output)
    output_dim = 16                 # number of classes

    key = jax.random.PRNGKey(0)
    kx, kwb, kbb, kwl, kbl = jax.random.split(key, 5)

    x = jax.random.normal(kx, (B, C, H, W), dtype=jnp.float32)

    # Deterministic parameter init (nn.Linear-style uniform bounds),
    # stored pre-transposed as [in, out] so the kernel computes x @ W + b
    # (equivalent to torch's x @ W.T + b).
    bound_b = 1.0 / jnp.sqrt(D)
    wb = jax.random.uniform(kwb, (D, input_dim), jnp.float32, -bound_b, bound_b)
    bb = jax.random.uniform(kbb, (1, input_dim), jnp.float32, -bound_b, bound_b)

    bound_l = 1.0 / jnp.sqrt(input_dim)
    wl = jax.random.uniform(kwl, (input_dim, output_dim), jnp.float32, -bound_l, bound_l)
    bl = jax.random.uniform(kbl, (1, output_dim), jnp.float32, -bound_l, bound_l)

    logits = bayesian_last_layer_forward(x, wb, bb, wl, bl)
    jax.block_until_ready(logits)

    ref = reference_forward(x, wb, bb, wl, bl)
    assert logits.shape == (B, output_dim)
    assert jnp.allclose(logits, ref, atol=2e-3, rtol=2e-3), "mismatch vs reference"

    print("KERNEL_OK")
</pallas_src>

<mosaic_0001>
module attributes {stable_mosaic.version = 11 : i64} {
  func.func @bll_kernel(%arg0: i32, %arg1: i32, %arg2: memref<8x512xbf16, #tpu.memory_space<vmem>>, %arg3: memref<512x128xbf16, #tpu.memory_space<vmem>>, %arg4: memref<1x128xf32, #tpu.memory_space<vmem>>, %arg5: memref<128x128xf32, #tpu.memory_space<vmem>>, %arg6: memref<1x128xf32, #tpu.memory_space<vmem>>, %arg7: memref<8x128xf32, #tpu.memory_space<vmem>>, %arg8: memref<8x128xf32, #tpu.memory_space<vmem>>) attributes {dimension_semantics = [#tpu.dimension_semantics<parallel>, #tpu.dimension_semantics<arbitrary>], iteration_bounds = array<i64: 1, 2>, scalar_prefetch = 0 : i64, scratch_operands = 1 : i64, tpu.core_type = #tpu.core_type<tc>, window_params = [{transform_indices = @transform_0, window_bounds = array<i64: 8, 512>}, {transform_indices = @transform_1, window_bounds = array<i64: 512, 128>}, {pipeline_mode = #tpu.pipeline_mode<synchronous>, transform_indices = @transform_2, window_bounds = array<i64: 1, 128>}, {pipeline_mode = #tpu.pipeline_mode<synchronous>, transform_indices = @transform_3, window_bounds = array<i64: 128, 128>}, {pipeline_mode = #tpu.pipeline_mode<synchronous>, transform_indices = @transform_4, window_bounds = array<i64: 1, 128>}, {transform_indices = @transform_5, window_bounds = array<i64: 8, 128>}]} {
    %c0_i32 = arith.constant 0 : i32
    %0 = arith.cmpi eq, %arg1, %c0_i32 : i32
    %1 = arith.extui %0 : i1 to i32
    %c0_i32_0 = arith.constant 0 : i32
    %2 = arith.cmpi ne, %1, %c0_i32_0 : i32
    scf.if %2 {
      %cst_9 = arith.constant 0.000000e+00 : f32
      %12 = vector.broadcast %cst_9 : f32 to vector<8x128xf32>
      %c0_10 = arith.constant 0 : index
      %c0_11 = arith.constant 0 : index
      %13 = vector.load %arg8[%c0_10, %c0_11] : memref<8x128xf32, #tpu.memory_space<vmem>>, vector<8x128xf32>
      tpu.vector_store %arg8[%c0_10, %c0_11], %12 {strides = array<i32>} : memref<8x128xf32, #tpu.memory_space<vmem>>, vector<8x128xf32>,
    } else {
    }
    %c0 = arith.constant 0 : index
    %c0_1 = arith.constant 0 : index
    %3 = vector.load %arg8[%c0, %c0_1] : memref<8x128xf32, #tpu.memory_space<vmem>>, vector<8x128xf32>
    %c0_2 = arith.constant 0 : index
    %c0_3 = arith.constant 0 : index
    %4 = vector.load %arg2[%c0_2, %c0_3] : memref<8x512xbf16, #tpu.memory_space<vmem>>, vector<8x512xbf16>
    %c0_4 = arith.constant 0 : index
    %c0_5 = arith.constant 0 : index
    %5 = vector.load %arg3[%c0_4, %c0_5] : memref<512x128xbf16, #tpu.memory_space<vmem>>, vector<512x128xbf16>
    %cst = arith.constant dense<0.000000e+00> : vector<8x128xf32>
    %6 = tpu.matmul %4, %5, %cst {dimension_numbers = #tpu.dot_dimension_numbers<[1], [0], [0], [1], [0, 0, 1, 1], [], []>} : vector<8x512xbf16>, vector<512x128xbf16>, vector<8x128xf32> -> vector<8x128xf32>
    %7 = arith.addf %3, %6 : vector<8x128xf32>
    %c0_6 = arith.constant 0 : index
    %c0_7 = arith.constant 0 : index
    %8 = vector.load %arg8[%c0_6, %c0_7] : memref<8x128xf32, #tpu.memory_space<vmem>>, vector<8x128xf32>
    tpu.vector_store %arg8[%c0_6, %c0_7], %7 {strides = array<i32>} : memref<8x128xf32, #tpu.memory_space<vmem>>, vector<8x128xf32>,
    %c1_i32 = arith.constant 1 : i32
    %9 = arith.cmpi eq, %arg1, %c1_i32 : i32
    %10 = arith.extui %9 : i1 to i32
    %c0_i32_8 = arith.constant 0 : i32
    %11 = arith.cmpi ne, %10, %c0_i32_8 : i32
    scf.if %11 {
      %c0_9 = arith.constant 0 : index
      %c0_10 = arith.constant 0 : index
      %12 = vector.load %arg8[%c0_9, %c0_10] : memref<8x128xf32, #tpu.memory_space<vmem>>, vector<8x128xf32>
      %c0_11 = arith.constant 0 : index
      %c0_12 = arith.constant 0 : index
      %13 = vector.load %arg4[%c0_11, %c0_12] : memref<1x128xf32, #tpu.memory_space<vmem>>, vector<1x128xf32>
      %14 = vector.broadcast %13 : vector<1x128xf32> to vector<8x128xf32>
      %15 = arith.addf %12, %14 : vector<8x128xf32>
      %cst_13 = arith.constant 0.000000e+00 : f32
      %16 = vector.broadcast %cst_13 : f32 to vector<8x128xf32>
      %17 = arith.maximumf %15, %16 : vector<8x128xf32>
      %c0_14 = arith.constant 0 : index
      %c0_15 = arith.constant 0 : index
      %18 = vector.load %arg5[%c0_14, %c0_15] : memref<128x128xf32, #tpu.memory_space<vmem>>, vector<128x128xf32>
      %cst_16 = arith.constant dense<0.000000e+00> : vector<8x128xf32>
      %19 = tpu.matmul %17, %18, %cst_16 {dimension_numbers = #tpu.dot_dimension_numbers<[1], [0], [0], [1], [0, 0, 1, 1], [], []>} : vector<8x128xf32>, vector<128x128xf32>, vector<8x128xf32> -> vector<8x128xf32>
      %c0_17 = arith.constant 0 : index
      %c0_18 = arith.constant 0 : index
      %20 = vector.load %arg6[%c0_17, %c0_18] : memref<1x128xf32, #tpu.memory_space<vmem>>, vector<1x128xf32>
      %21 = vector.broadcast %20 : vector<1x128xf32> to vector<8x128xf32>
      %22 = arith.addf %19, %21 : vector<8x128xf32>
      %c0_19 = arith.constant 0 : index
      %c0_20 = arith.constant 0 : index
      %23 = vector.load %arg7[%c0_19, %c0_20] : memref<8x128xf32, #tpu.memory_space<vmem>>, vector<8x128xf32>
      tpu.vector_store %arg7[%c0_19, %c0_20], %22 {strides = array<i32>} : memref<8x128xf32, #tpu.memory_space<vmem>>, vector<8x128xf32>,
    } else {
    }
    return
  }
  func.func @transform_0(%arg0: i32, %arg1: i32) -> (i32, i32) {
    %c0_i32 = arith.constant 0 : i32
    return %arg0, %arg1 : i32, i32
  }
  func.func @transform_1(%arg0: i32, %arg1: i32) -> (i32, i32) {
    %c0_i32 = arith.constant 0 : i32
    %c0_i32_0 = arith.constant 0 : i32
    return %arg1, %c0_i32 : i32, i32
  }
  func.func @transform_2(%arg0: i32, %arg1: i32) -> (i32, i32) {
    %c0_i32 = arith.constant 0 : i32
    %c0_i32_0 = arith.constant 0 : i32
    %c0_i32_1 = arith.constant 0 : i32
    return %c0_i32, %c0_i32_0 : i32, i32
  }
  func.func @transform_3(%arg0: i32, %arg1: i32) -> (i32, i32) {
    %c0_i32 = arith.constant 0 : i32
    %c0_i32_0 = arith.constant 0 : i32
    %c0_i32_1 = arith.constant 0 : i32
    return %c0_i32, %c0_i32_0 : i32, i32
  }
  func.func @transform_4(%arg0: i32, %arg1: i32) -> (i32, i32) {
    %c0_i32 = arith.constant 0 : i32
    %c0_i32_0 = arith.constant 0 : i32
    %c0_i32_1 = arith.constant 0 : i32
    return %c0_i32, %c0_i32_0 : i32, i32
  }
  func.func @transform_5(%arg0: i32, %arg1: i32) -> (i32, i32) {
    %c0_i32 = arith.constant 0 : i32
    %c0_i32_0 = arith.constant 0 : i32
    return %arg0, %c0_i32 : i32, i32
  }
}

</mosaic_0001>

<bundles_post_ra>
// kernel: tpu_custom_call.1
= control target key start
LH: loop header
LB: loop body
LE: loop exit
PB: predicated region body
PF: predicated region fallthrough
CT: control target
= control target key end

     0   :  { %s1559_s0 = inlined_call_operand.hbm [shape: bf16[8,1024], index: 0, kind: input, shape index: {}]   ;;  %s1560_s1 = inlined_call_operand.hbm [shape: bf16[1024,128], index: 1, kind: input, shape index: {}]   ;;  %s1561_s2 = inlined_call_operand.vmem [shape: f32[1,128], index: 2, kind: input, shape index: {}]   ;;  %s1562_s3 = inlined_call_operand.hbm [shape: f32[128,128], index: 3, kind: input, shape index: {}]   ;;  %s1563_s4 = inlined_call_operand.vmem [shape: f32[1,128], index: 4, kind: input, shape index: {}]   ;;  %s1564_s5 = inlined_call_operand.hbm [shape: f32[8,128], index: 5, kind: output, shape index: {}]  }
   0x1   :  { %1565 = sst [smem:[#allocation14_spill]] %s1559_s0 }
   0x2   :  { %10 = vsyncpa [#allocation4], 0 }
   0x3   :  { %12 = vsyncpa [#allocation4 + $0x1], 0 }
   0x4   :  { %13 = vsyncpa [#allocation7], 0 }
   0x5   :  { %15 = vsyncpa [#allocation7 + $0x1], 0 }
   0x6   :  { %16 = vsyncpa [#allocation5], 0  ;;  %s1368_s18 = smov 0   ;;  %s1370_s19 = smov 0  }
   0x7   :  { %s1372_s20 = smov 0   ;;  %s1374_s21 = smov 0  }
   0x8   :  { %s1376_s22 = smov 0   ;;  %s1378_s23 = smov 0  }
   0x9 LB: > { %s1397_s24 = sadd.s32 4294967295, %s1325_s23   ;;  %p56_p0 = scmp.ne.s32.totalorder %s1309_s19, %s1305_s18  ;;  %s1325_s23 = sphi %s1378_s23, %s22_s23   ;;  %s1321_s22 = sphi %s1376_s22, %s1575_s22   ;;  %s1317_s21 = sphi %s1374_s21, %s1574_s21   ;;  %s1313_s20 = sphi %s1372_s20, %s1573_s20   ;;  %s1309_s19 = sphi %s1370_s19, %s1572_s19   ;;  %s1305_s18 = sphi %s1368_s18, %s1571_s18  }
   0xa   : > { %p57_p1 = scmp.eq.s32.totalorder %s1397_s24, 0  ;;  %p881_p2 = scmp.ge.s32.totalorder %s1325_s23, 1 }
   0xb   : > { %p182_p3 = scmp.lt.s32.totalorder %s1325_s23, 3  ;;  %s1327_s27 = smov [#allocation8]  }
   0xc   : > { %p1405_p4 = por %p57_p1, %p56_p0  ;;  %s197_s28 = sshll.u32 %s1327_s27, 4  ;;  %s198_s28 = int_to_ptr.vmem [resolvable:$true] %s197_s28 }
   0xd   : > { %p1409_p5 = pnand %p881_p2, %p182_p3  ;;  %s31_s30 = sadd.s32 1, %s1321_s22 }
   0xe   : > { %s1168_s6 = scalar_lea.vmem %s198_s28, 2048  ;;  %p1176_p12 = scmp.lt.s32.totalorder %s198_s28, %s198_s28 }
   0xf   : > { %p1048_p6 = pneg %p1409_p5  ;;  %p1169_p9 = scmp.ne.s32.totalorder %s198_s28, %s1168_s6 }
  0x10   : > { %p1177_p13 = scmp.lt.s32.totalorder %s1168_s6, %s1168_s6 }
  0x11   : > { %p1417_p7 = pnand %p1048_p6, %p57_p1 }
  0x12   : > { %p1178_p0 = por %p1177_p13, %p1176_p12 }
  0x13   : > { %p1159_p8 = pneg %p1417_p7 }
  0x15   : > { %p1171_p10 = pnand %p1169_p9, %p1159_p8 }
  0x17   : > { %p1172_p11 = pneg %p1171_p10 }
  0x19   : > { %p1179_p2 = pnand %p1178_p0, %p1172_p11 }
  0x1b   : > { %1182 = shalt.err (!%p1179_p2)
}
  0x1c   : > { %s1328_s7 = smov 128   ;;  %s1329_s8 = smov 8  }
  0x1d   : > { %1051 = dma.hbm_to_vmem [thread:$0]  (!%p1417_p7), %s1562_s3, 2048, %s198_s28, [#allocation7], %s1328_s7, %s1328_s7, %s1329_s8  }
  0x1e   : > { %p32_p3 = scmp.ge.s32.totalorder %s31_s30, 2  ;;  %s43_s11 = sadd.s32 1, %s1313_s20 }
  0x1f   : > { %p50_p6 = scmp.ne.s32.totalorder %s1313_s20, %s1309_s19  ;;  %p51_p8 = scmp.eq.s32.totalorder %s1325_s23, 0 }
  0x20   : > { %s1577_s30 = smov (%p32_p3, %s31_s30), 0  ;;  %p1060_p10 = scmp.lt.s32.totalorder %s1325_s23, 2 }
  0x21   : > { %p52_p9 = por %p51_p8, %p50_p6  ;;  %s39_s12 = ssub.s32 %s1321_s22, %s1577_s30 }
  0x22   : > { %s214_s13 = sand.u32 1, %s1313_s20   ;;  %p41_p11 = scmp.eq.s32.totalorder %s39_s12, 0 }
  0x23   : > { %s884_s14 = sshll.u32 %s214_s13, 4  ;;  %s938_s15 = sshll.u32 %s1321_s22, 8 }
  0x24   : > { %s1441_s16 = scalar_select %p41_p11, %s1313_s20, %s43_s11  }
  0x25   : > { %s1569_s0 = sld [smem:[#allocation14_spill]]  ;;  %s218_s28 = scalar_lea.vmem [#allocation3], %s884_s14 }
  0x26   : > { %s228_s29 = sshll.u32 %s218_s28, 4  ;;  %p1446_p7 = pnand %p1060_p10, %p52_p9  ;;  %s229_s29 = int_to_ptr.vmem [resolvable:$true] %s228_s29 }
  0x27   : > { %s887_s7 = sshll.u32 %s214_s13, 8  ;;  %s215_s8 = scalar_lea.sflag [#allocation4], %s214_s13 }
  0x28   : > { %p1185_p12 = pneg %p1446_p7  ;;  %s1196_s9 = scalar_lea.vmem %s229_s29, 256 }
  0x29   : > { %p1197_p13 = scmp.ne.s32.totalorder %s229_s29, %s1196_s9  ;;  %s1330_s10 = smov [#allocation3]  }
  0x2a   : > { %s1201_s11 = sshll.u32 %s1330_s10, 4  ;;  %s1202_s11 = int_to_ptr.vmem [resolvable:$false] %s1201_s11 }
  0x2b   : > { %s226_s27 = scalar_lea.hbm %s1569_s0, %s938_s15  ;;  %p1199_p0 = pnand %p1197_p13, %p1185_p12 }
  0x2c   : > { %s1203_s12 = scalar_lea.vmem %s1202_s11, 512  ;;  %p1204_p3 = scmp.lt.s32.totalorder %s229_s29, %s1202_s11 }
  0x2d   : > { %p1200_p2 = pneg %p1199_p0  ;;  %p1205_p6 = scmp.lt.s32.totalorder %s1203_s12, %s1196_s9 }
  0x2f   : > { %p1206_p8 = por %p1205_p6, %p1204_p3 }
  0x31   : > { %p1207_p9 = pnand %p1206_p8, %p1200_p2 }
  0x33   : > { %1210 = shalt.err (!%p1207_p9)
}
  0x34   : > { %1055 = dma.hbm_to_vmem [thread:$0]  (!%p1446_p7), %s226_s27, 256, %s229_s29, %s215_s8  }
  0x35   : > { %s939_s13 = sshll.u32 %s1321_s22, 12  ;;  %s239_s14 = scalar_lea.vmem [#allocation6], %s887_s7 }
  0x36   : > { %s246_s15 = sshll.u32 %s239_s14, 4  ;;  %s235_s17 = sand.u32 1, %s1325_s23   ;;  %s247_s15 = int_to_ptr.vmem [resolvable:$true] %s246_s15 }
  0x37   : > { %s245_s10 = scalar_lea.hbm %s1560_s1, %s939_s13  ;;  %s236_s11 = scalar_lea.sflag [#allocation7], %s235_s17 }
  0x38   : > { %s1224_s9 = scalar_lea.vmem %s247_s15, 4096  ;;  %s1331_s12 = smov [#allocation6]  }
  0x39   : > { %p1225_p10 = scmp.ne.s32.totalorder %s247_s15, %s1224_s9  ;;  %s1229_s0 = sshll.u32 %s1331_s12, 4  ;;  %s1230_s0 = int_to_ptr.vmem [resolvable:$false] %s1229_s0 }
  0x3a   : > { %s1231_s27 = scalar_lea.vmem %s1230_s0, 8192  ;;  %p1232_p0 = scmp.lt.s32.totalorder %s247_s15, %s1230_s0 }
  0x3b   : > { %p1227_p11 = pnand %p1225_p10, %p1185_p12  ;;  %p1233_p2 = scmp.lt.s32.totalorder %s1231_s27, %s1224_s9 }
  0x3d   : > { %p1228_p13 = pneg %p1227_p11  ;;  %p1234_p3 = por %p1233_p2, %p1232_p0 }
  0x3f   : > { %p1235_p6 = pnand %p1234_p3, %p1228_p13 }
  0x41   : > { %1238 = shalt.err (!%p1235_p6)
}
  0x42   : > { %s1332_s29 = smov 64   ;;  %s1333_s7 = smov 4  }
  0x43   : > { %1058 = dma.hbm_to_vmem [thread:$0]  (!%p1446_p7), %s245_s10, 4096, %s247_s15, %s236_s11, %s1332_s29, %s1332_s29, %s1333_s7  }
  0x44   : > { %258 = sbr.rel (%p1409_p5) target bundleno = 569 (0x239), region = 40  ;;  %s260_s8 = sand.u32 (!%p1409_p5), 1, %s1309_s19  }
  0x45   : > { %s891_s13 = sshll.u32 (!%p1409_p5), %s260_s8, 4  ;;  %s261_s14 = scalar_lea.sflag (!%p1409_p5), [#allocation4], %s260_s8 }
  0x46   : > { %s1470_s17 = scalar_lea.vmem (!%p1409_p5), [#allocation3], %s891_s13 }
  0x49   : > { %1288 = dma.done.wait (%p1405_p4), %s261_s14, 256  }
  0x4a   : > { %1290 = vsyncadd (%p1405_p4), %s261_s14, 4294967040  ;;  %s269_s0 = sand.u32 1, %s1397_s24   ;;  %s892_s6 = sshll.u32 %s260_s8, 8 }
  0x4b   : > { %s270_s15 = scalar_lea.sflag [#allocation7], %s269_s0  ;;  %s1477_s18 = scalar_lea.vmem [#allocation6], %s892_s6 }
  0x4c   : > { %1292 = dma.done.wait (%p1405_p4), %s270_s15, 4096  }
  0x4d   : > { %1294 = vsyncadd (%p1405_p4), %s270_s15, 4294963200 }
  0x4e   : > { %1296 = dma.done.wait (%p57_p1), [#allocation7], 2048  }
  0x4f   : > { %1298 = vsyncadd (%p57_p1), [#allocation7], 4294965248  ;;  %p894_p5 = scmp.ne.s32.totalorder %s1317_s21, 0 }
  0x51   : > { %310 = sbr.rel (%p894_p5) target bundleno = 88 (0x58), region = 56 }
  0x56   : > { %v1334_v0 = vmov 0.0  }
  0x57   : > { %311 = vst [vmem:[#allocation2] sm:$0xff] %v1334_v0 }
  0x58 PF: > { %v1121_v1 = vld [vmem:[%s1477_s18 + $0x78] sm:$0xff]   ;;  %v1125_v5 = vld [vmem:[%s1477_s18 + $0x70] sm:$0xff]   ;;  %v1129_v9 = vld [vmem:[%s1477_s18 + $0x68] sm:$0xff]   ;;  %p931_p1 = scmp.ne.s32.totalorder %s1317_s21, 1 }
  0x59   : > { %v1122_v2 = vld [vmem:[%s1477_s18 + $0xf8] sm:$0xff]   ;;  %940 = vmatprep.subr.bf16.mxu0 %v1121_v1  ;;  %v1126_v6 = vld [vmem:[%s1477_s18 + $0xf0] sm:$0xff]   ;;  %v1130_v10 = vld [vmem:[%s1477_s18 + $0xe8] sm:$0xff]  }
  0x5a   : > { %v1123_v3 = vld [vmem:[%s1477_s18 + $0x38] sm:$0xff]   ;;  %962 = vmatprep.subr.bf16.mxu1 %v1122_v2  ;;  %v1127_v7 = vld [vmem:[%s1477_s18 + $0x30] sm:$0xff]   ;;  %v1131_v11 = vld [vmem:[%s1477_s18 + $0x28] sm:$0xff]  }
  0x5b   : > { %v1124_v4 = vld [vmem:[%s1477_s18 + $0xb8] sm:$0xff]   ;;  %941 = vmatpush3.bf16.msra.mxu0 %v1123_v3  ;;  %v1128_v8 = vld [vmem:[%s1477_s18 + $0xb0] sm:$0xff]   ;;  %v1132_v12 = vld [vmem:[%s1477_s18 + $0xa8] sm:$0xff]  }
  0x5c   : > { %963 = vmatpush3.bf16.msra.mxu1 %v1124_v4  ;;  %942 = vmatprep.subr.bf16.mxu0 %v1125_v5  ;;  %v1133_v13 = vld [vmem:[%s1477_s18 + $0x60] sm:$0xff]   ;;  %v1137_v17 = vld [vmem:[%s1477_s18 + $0x58] sm:$0xff]   ;;  %v1141_v21 = vld [vmem:[%s1477_s18 + $0x50] sm:$0xff]  }
  0x5d   : > { %964 = vmatprep.subr.bf16.mxu1 %v1126_v6  ;;  %v1134_v14 = vld [vmem:[%s1477_s18 + $0xe0] sm:$0xff]   ;;  %v1138_v18 = vld [vmem:[%s1477_s18 + $0xd8] sm:$0xff]   ;;  %v1142_v22 = vld [vmem:[%s1477_s18 + $0xd0] sm:$0xff]  }
  0x5e   : > { %v1135_v15 = vld [vmem:[%s1477_s18 + $0x20] sm:$0xff]   ;;  %v1139_v19 = vld [vmem:[%s1477_s18 + $0x18] sm:$0xff]   ;;  %v1143_v23 = vld [vmem:[%s1477_s18 + $0x10] sm:$0xff]  }
  0x5f   : > { %943 = vmatpush3.bf16.msra.mxu0 %v1127_v7  ;;  %v1136_v16 = vld [vmem:[%s1477_s18 + $0xa0] sm:$0xff]   ;;  %v1140_v20 = vld [vmem:[%s1477_s18 + $0x98] sm:$0xff]   ;;  %v1144_v24 = vld [vmem:[%s1477_s18 + $0x90] sm:$0xff]  }
  0x60   : > { %965 = vmatpush3.bf16.msra.mxu1 %v1128_v8  ;;  %944 = vmatprep.subr.bf16.mxu0 %v1129_v9  ;;  %v1145_v25 = vld [vmem:[%s1477_s18 + $0x48] sm:$0xff]   ;;  %v1149_v29 = vld [vmem:[%s1477_s18 + $0x40] sm:$0xff]   ;;  %v312_v45 = vld [vmem:[#allocation2] sm:$0xff] }
  0x61   : > { %966 = vmatprep.subr.bf16.mxu1 %v1130_v10  ;;  %v1146_v26 = vld [vmem:[%s1477_s18 + $0xc8] sm:$0xff]   ;;  %v1150_v30 = vld [vmem:[%s1477_s18 + $0xc0] sm:$0xff]  }
  0x62   : > { %v1147_v27 = vld [vmem:[%s1477_s18 + $0x8] sm:$0xff]   ;;  %v1151_v31 = vld [vmem:[%s1477_s18] sm:$0xff]  }
  0x63   : > { %945 = vmatpush3.bf16.msra.mxu0 %v1131_v11  ;;  %v1148_v28 = vld [vmem:[%s1477_s18 + $0x88] sm:$0xff]   ;;  %v1152_v32 = vld [vmem:[%s1477_s18 + $0x80] sm:$0xff]  }
  0x64   : > { %967 = vmatpush3.bf16.msra.mxu1 %v1132_v12  ;;  %946 = vmatprep.subr.bf16.mxu0 %v1133_v13  ;;  %v313_v33 = vld [vmem:[%s1470_s17] sm:$0xff]  ;;  %v314_v34 = vld [vmem:[%s1470_s17 + $0x8] sm:$0xff] }
  0x65   : > { %968 = vmatprep.subr.bf16.mxu1 %v1134_v14  ;;  %v895_v35 = vcombine.low %v313_v33, %v313_v33  ;;  %v896_v36 = vcombine.high %v313_v33, %v313_v33  ;;  %v897_v37 = vcombine.low %v314_v34, %v314_v34  ;;  %v898_v38 = vcombine.high %v314_v34, %v314_v34 }
  0x67   : > { %947 = vmatpush3.bf16.msra.mxu0 %v1135_v15  ;;  %617 = vmatprep.mubr.bf16.mxu0 %v896_v36 }
  0x68   : > { %969 = vmatpush3.bf16.msra.mxu1 %v1136_v16  ;;  %948 = vmatprep.subr.bf16.mxu0 %v1137_v17 }
  0x69   : > { %970 = vmatprep.subr.bf16.mxu1 %v1138_v18  ;;  %657 = vmatprep.mubr.bf16.mxu1 %v898_v38 }
  0x6b   : > { %949 = vmatpush3.bf16.msra.mxu0 %v1139_v19 }
  0x6c   : > { %971 = vmatpush3.bf16.msra.mxu1 %v1140_v20  ;;  %950 = vmatprep.subr.bf16.mxu0 %v1141_v21 }
  0x6d   : > { %972 = vmatprep.subr.bf16.mxu1 %v1142_v22 }
  0x6f   : > { %951 = vmatpush3.bf16.msra.mxu0 %v1143_v23 }
  0x70   : > { %973 = vmatpush3.bf16.msra.mxu1 %v1144_v24  ;;  %952 = vmatprep.subr.bf16.mxu0 %v1145_v25 }
  0x71   : > { %974 = vmatprep.subr.bf16.mxu1 %v1146_v26 }
  0x73   : > { %953 = vmatpush3.bf16.msra.mxu0 %v1147_v27 }
  0x74   : > { %975 = vmatpush3.bf16.msra.mxu1 %v1148_v28  ;;  %954 = vmatprep.subr.bf16.mxu0 %v1149_v29 }
  0x75   : > { %976 = vmatprep.subr.bf16.mxu1 %v1150_v30 }
  0x77   : > { %955 = vmatpush3.bf16.msra.mxu0 %v1151_v31 }
  0x78   : > { %977 = vmatpush3.bf16.msra.mxu1 %v1152_v32 }
  0x7a   : > { %618 = vmatmul.mubr.bf16.vlgmr.msra.gmra.mxu0 %v895_v35 }
  0x7b   : > { %658 = vmatmul.mubr.bf16.vlgmr.msra.gmra.mxu1 %v897_v37 }
 0x13a   : > { %v956_v39 = vpop.f32.mrf.mxu0 }
 0x13b   : > { %v978_v40 = vpop.f32.mrf.mxu1 }
 0x13c   : > { %v957_v41 = vpop.f32.mrf.mxu0 }
 0x13d   : > { %v979_v42 = vpop.f32.mrf.mxu1  ;;  %v958_v43 = vadd.f32 %v957_v41, %v956_v39 }
 0x13e   : > { %v980_v44 = vadd.f32 %v979_v42, %v978_v40  ;;  %v959_v46 = vpop.f32.mrf.mxu0 }
 0x13f   : > { %v981_v47 = vpop.f32.mrf.mxu1 }
 0x140   : > { %v660_v48 = vadd.f32 %v980_v44, %v958_v43  ;;  %v960_v49 = vpop.f32.mrf.mxu0  ;;  %670 = sbr.rel (%p931_p1) target bundleno = 554 (0x22a), region = 60 }
 0x141   : > { %v982_v50 = vpop.f32.mrf.mxu1 }
 0x142   : > { %v665_v51 = vadd.f32 %v660_v48, %v312_v45 }
 0x144   : > { %666 = vst [vmem:[#allocation2] sm:$0xff] %v665_v51 }
 0x145   : > { %v696_v52 = vld [vmem:[#allocation8 + $0x78] sm:$0xff]  ;;  %v1335_v53 = vmov 0.0   ;;  %v695_v54 = vld [vmem:[#allocation8 + $0x70] sm:$0xff]  ;;  %vm1336_vm0 = vmmov 0   ;;  %v694_v55 = vld [vmem:[#allocation8 + $0x68] sm:$0xff] }
 0x146   : > { %1001 = vmatprep.subr.mxu0 %v1335_v53  ;;  %1033 = vmatprep.mubr.msk.f32.mxu0 %vm1336_vm0, %v1335_v53  ;;  %v693_v56 = vld [vmem:[#allocation8 + $0x60] sm:$0xff]  ;;  %v692_v57 = vld [vmem:[#allocation8 + $0x58] sm:$0xff]  ;;  %v691_v58 = vld [vmem:[#allocation8 + $0x50] sm:$0xff] }
 0x147   : > { %1002 = vmatpush3.msra.mxu0 %v696_v52  ;;  %v690_v59 = vld [vmem:[#allocation8 + $0x48] sm:$0xff]  ;;  %v689_v60 = vld [vmem:[#allocation8 + $0x40] sm:$0xff]  ;;  %v688_v61 = vld [vmem:[#allocation8 + $0x38] sm:$0xff] }
 0x148   : > { %1003 = vmatprep.subr.mxu0 %v1335_v53  ;;  %v687_v62 = vld [vmem:[#allocation8 + $0x30] sm:$0xff]  ;;  %v686_v63 = vld [vmem:[#allocation8 + $0x28] sm:$0xff]  ;;  %v685_v0 = vld [vmem:[#allocation8 + $0x20] sm:$0xff] }
 0x149   : > { %1004 = vmatpush3.msra.mxu0 %v695_v54  ;;  %v932_v2 = vld [vmem:[%s1561_s2] ss:$0 sm:$0xff]  ;;  %v683_v4 = vld [vmem:[#allocation8 + $0x10] sm:$0xff]  ;;  %v682_v6 = vld [vmem:[#allocation8 + $0x8] sm:$0xff] }
 0x14a   : > { %1005 = vmatprep.subr.mxu0 %v1335_v53  ;;  %v684_v3 = vld [vmem:[#allocation8 + $0x18] sm:$0xff]  ;;  %v681_v7 = vld [vmem:[#allocation8] sm:$0xff] }
 0x14b   : > { %1006 = vmatpush3.msra.mxu0 %v694_v55  ;;  %v671_v1 = vld [vmem:[#allocation2] sm:$0xff] }
 0x14c   : > { %1007 = vmatprep.subr.mxu0 %v1335_v53  ;;  %v679_v5 = vadd.f32 %v932_v2, %v671_v1  ;;  %v933_v9 = vld [vmem:[%s1563_s4] ss:$0 sm:$0xff] }
 0x14d   : > { %1008 = vmatpush3.msra.mxu0 %v693_v56 }
 0x14e   : > { %1009 = vmatprep.subr.mxu0 %v1335_v53  ;;  %v680_v8 = vmax.f32 %v679_v5, 0.0 }
 0x14f   : > { %1010 = vmatpush3.msra.mxu0 %v692_v57 }
 0x150   : > { %1011 = vmatprep.subr.mxu0 %v1335_v53 }
 0x151   : > { %1012 = vmatpush3.msra.mxu0 %v691_v58 }
 0x152   : > { %1013 = vmatprep.subr.mxu0 %v1335_v53 }
 0x153   : > { %1014 = vmatpush3.msra.mxu0 %v690_v59 }
 0x154   : > { %1015 = vmatprep.subr.mxu0 %v1335_v53 }
 0x155   : > { %1016 = vmatpush3.msra.mxu0 %v689_v60 }
 0x156   : > { %1017 = vmatprep.subr.mxu0 %v1335_v53 }
 0x157   : > { %1018 = vmatpush3.msra.mxu0 %v688_v61 }
 0x158   : > { %1019 = vmatprep.subr.mxu0 %v1335_v53 }
 0x159   : > { %1020 = vmatpush3.msra.mxu0 %v687_v62 }
 0x15a   : > { %1021 = vmatprep.subr.mxu0 %v1335_v53 }
 0x15b   : > { %1022 = vmatpush3.msra.mxu0 %v686_v63 }
 0x15c   : > { %1023 = vmatprep.subr.mxu0 %v1335_v53 }
 0x15d   : > { %1024 = vmatpush3.msra.mxu0 %v685_v0 }
 0x15e   : > { %1025 = vmatprep.subr.mxu0 %v1335_v53 }
 0x15f   : > { %1026 = vmatpush3.msra.mxu0 %v684_v3 }
 0x160   : > { %1027 = vmatprep.subr.mxu0 %v1335_v53 }
 0x161   : > { %1028 = vmatpush3.msra.mxu0 %v683_v4 }
 0x162   : > { %1029 = vmatprep.subr.mxu0 %v1335_v53 }
 0x163   : > { %1030 = vmatpush3.msra.mxu0 %v682_v6 }
 0x164   : > { %1031 = vmatprep.subr.mxu0 %v1335_v53 }
 0x165   : > { %1032 = vmatpush3.msra.mxu0 %v681_v7 }
 0x166   : > { %1034 = vmatmul.mubr.f32.vlgmr.msra.gmra.mxu0 %v680_v8 }
 0x226   : > { %v770_v10 = vpop.f32.mrf.mxu0 }
 0x227   : > { %v771_v11 = vadd.f32 %v933_v9, %v770_v10 }
 0x228   : > { %v1035_v12 = vpop.f32.mrf.mxu0 }
 0x229   : > { %774 = vst [vmem:[#allocation9] sm:$0xff] %v771_v11 }
 0x22a PF: > { %p1062_p4 = scmp.eq.s32.totalorder %s1397_s24, 1  ;;  %s1337_s10 = smov [#allocation9]  }
 0x22b   : > { %s784_s11 = sshll.u32 %s1337_s10, 4  ;;  %s785_s11 = int_to_ptr.vmem [resolvable:$true] %s784_s11 }
 0x22c   : > { %s1239_s9 = scalar_lea.vmem %s785_s11, 128  ;;  %p1246_p9 = scmp.lt.s32.totalorder %s785_s11, %s785_s11 }
 0x22d   : > { %p1240_p7 = scmp.ne.s32.totalorder %s785_s11, %s1239_s9  ;;  %p1247_p10 = scmp.lt.s32.totalorder %s1239_s9, %s1239_s9 }
 0x22f   : > { %p1241_p12 = pnand %p1240_p7, %p1062_p4  ;;  %p1248_p11 = por %p1247_p10, %p1246_p9 }
 0x231   : > { %p1242_p8 = pneg %p1241_p12 }
 0x233   : > { %p1249_p13 = pnand %p1248_p11, %p1242_p8 }
 0x235   : > { %1252 = shalt.err (!%p1249_p13)
}
 0x236   : > { %1045 = dma.vmem_to_hbm [thread:$0]  (%p1062_p4), %s785_s11, 128, %s1564_s5, [#allocation5]  }
 0x237   : > { %1300 = dma.done.wait (%p1062_p4), [#allocation5], 128  }
 0x238   : > { %1302 = vsyncadd (%p1062_p4), [#allocation5], 4294967168 }
 0x239 PF: > { %s22_s23 = sadd.s32 1, %s1325_s23   ;;  %s1571_s18 = smov %s1309_s19 }
 0x23a   : > { %p19_p0 = scmp.ge.s32.totalorder %s22_s23, 4   ;;  %s1572_s19 = smov %s1313_s20 }
 0x23b   : > { %s1573_s20 = smov %s1441_s16  ;;  %s1574_s21 = smov %s1321_s22 }
 0x23c   : > { %s1575_s22 = smov %s1577_s30  ;;  %21 = sbr.rel (!%p19_p0) target bundleno = 9 (0x9), region = 103 }
 0x241   :  { %797 = vsyncpa [#allocation4], 1 }
 0x242   :  { %799 = vsyncpa [#allocation4 + $0x1], 1 }
 0x243   :  { %800 = vsyncpa [#allocation7], 1 }
 0x244   :  { %802 = vsyncpa [#allocation7 + $0x1], 1 }
 0x245   :  { %803 = vsyncpa [#allocation5], 1 }
 0x246   :  { %805 = vsyncpa [#allocation5 + $0x1], 1 }

</bundles_post_ra>
